<compile_context>
chip_gen: v6e
topology: v6e:2x2x1
jax: 0.10.0
libtpu: 0.0.40
codegen_flags: <defaults>
</compile_context>

<pallas_src>
import functools

import jax
import jax.numpy as jnp
from jax.experimental import pallas as pl
from jax.experimental.pallas import tpu as pltpu


def _round_up(x, m):
    return (x + m - 1) // m * m


def _pick_tb(batch, preferred=4):
    """Images per grid step; keeps the parallel grid length >= 2 when B >= 2."""
    if batch <= 1:
        return 1
    return min(preferred, max(1, batch // 2))


def _embed_kernel(patch_ref, w_ref, pos_ref, out_ref):
    # patch_ref: (TB, S, Kp) bf16   row 0 of each image is an all-zero "cls" patch
    # w_ref:     (Kp, Ep)    bf16   Conv2d weight reshaped (E,K) -> (K,E), zero-padded
    # pos_ref:   (S, Ep)     f32    row 0 = cls_token + pos[0];
    #                               rows 1.. = pos[1:] + conv bias (bias folded in)
    # out_ref:   (TB, S, Ep)
    w = w_ref[...]        # resident weight tile
    pos = pos_ref[...]    # hoisted out of the per-image loop (no repeated broadcast)
    for b in range(patch_ref.shape[0]):                      # TB is small & static
        acc = jnp.dot(patch_ref[b], w,
                      preferred_element_type=jnp.float32)    # MXU, f32 accumulate
        out_ref[b] = (acc + pos).astype(out_ref.dtype)       # f32 epilogue


def embed_layer_forward(x, conv_w, conv_b, cls_token, pos_embedding, patch_size,
                        compute_dtype=jnp.bfloat16, out_dtype=None,
                        preferred_tb=4):
    """Forward pass equivalent to the PyTorch EmbedLayer.

    x:             (B, C, H, W)   NCHW image
    conv_w:        (E, C, P, P)   Conv2d weight (stride == kernel_size == P)
    conv_b:        (E,)           Conv2d bias
    cls_token:     (1, 1, E)
    pos_embedding: (1, N+1, E)    N = (H//P) * (W//P)
    returns:       (B, N+1, E) in out_dtype (defaults to x.dtype)
    """
    B, C, H, W = x.shape
    E = conv_w.shape[0]
    P = patch_size
    Hp, Wp = H // P, W // P
    N = Hp * Wp
    K = C * P * P
    S = N + 1
    if out_dtype is None:
        out_dtype = x.dtype

    # Pad lane/contraction dims to 128 multiples (exact: zero padding), and batch
    # to a multiple of the per-step block TB.
    Kp = _round_up(K, 128)
    Ep = _round_up(E, 128)
    TB = _pick_tb(B, preferred_tb)
    Bp = _round_up(B, TB)

    # Patch extraction (stride==kernel conv == patch matmul), row-major over the
    # patch grid with (C, P, P) flattening matching the Conv2d weight layout.
    # One zero row is prepended per image (cls slot) and K is zero-padded.
    # NOTE: materialized once by XLA at full HBM bandwidth (no strided DMA fusion).
    patches = x.reshape(B, C, Hp, P, Wp, P)
    patches = jnp.transpose(patches, (0, 2, 4, 1, 3, 5)).reshape(B, N, K)
    patches = jnp.pad(patches, ((0, Bp - B), (1, 0), (0, Kp - K)))
    patches = patches.astype(compute_dtype)                                # (Bp, S, Kp)

    # Matmul weight (bf16 for the MXU) and fused cls/pos/bias table (f32).
    # TODO(synk): in production these are per-parameter-set constants; precompute
    # them once outside the step function instead of rebuilding per call.
    w_mat = jnp.pad(conv_w.reshape(E, K).T, ((0, Kp - K), (0, Ep - E)))
    w_mat = w_mat.astype(compute_dtype)                                    # (Kp, Ep)
    pos_full = jnp.concatenate(
        [cls_token[0] + pos_embedding[0, :1, :],                           # (1, E)
         pos_embedding[0, 1:, :] + conv_b[None, :]],                       # (N, E)
        axis=0)
    pos_full = jnp.pad(pos_full, ((0, 0), (0, Ep - E))).astype(jnp.float32)  # (S, Ep)

    # VMEM budget: double-buffered patches + out, resident-ish weight + pos.
    itemsize_c = jnp.dtype(compute_dtype).itemsize
    itemsize_o = jnp.dtype(out_dtype).itemsize
    vmem_needed = (2 * TB * S * Kp * itemsize_c          # patches (double-buffered)
                   + 2 * TB * S * Ep * itemsize_o        # out     (double-buffered)
                   + 2 * Kp * Ep * itemsize_c            # weight
                   + 2 * S * Ep * 4)                     # pos table
    vmem_limit = int(min(max(2 * vmem_needed, 16 * 1024 * 1024), 48 * 1024 * 1024))

    out = pl.pallas_call(
        _embed_kernel,
        out_shape=jax.ShapeDtypeStruct((Bp, S, Ep), out_dtype),
        grid_spec=pltpu.PrefetchScalarGridSpec(
            num_scalar_prefetch=0,
            grid=(Bp // TB,),
            in_specs=[
                pl.BlockSpec((TB, S, Kp), lambda b: (b, 0, 0)),  # this step's patches
                pl.BlockSpec((Kp, Ep), lambda b: (0, 0)),        # weight (resident)
                pl.BlockSpec((S, Ep), lambda b: (0, 0)),         # cls/pos/bias table
            ],
            out_specs=pl.BlockSpec((TB, S, Ep), lambda b: (b, 0, 0)),
        ),
        compiler_params=pltpu.CompilerParams(
            dimension_semantics=("parallel",),
            vmem_limit_bytes=vmem_limit,
        ),
    )(patches, w_mat, pos_full)

    # Slice away batch / embed padding (no-op when already aligned).
    if Bp != B or Ep != E:
        out = out[:B, :, :E]
    return out


if __name__ == "__main__":
    # Small ViT-ish config consistent with the module's __init__.
    batch = 2
    n_channels = 4
    img_size = 16
    patch_size = 4
    embed_dim = 32
    n_patches = (img_size // patch_size) ** 2          # 16
    patch_dim = n_channels * patch_size * patch_size   # 64

    key = jax.random.PRNGKey(0)
    kx, kw, kb, kc, kp = jax.random.split(key, 5)

    x = jax.random.normal(kx, (batch, n_channels, img_size, img_size), jnp.float32)
    conv_w = 0.02 * jax.random.normal(
        kw, (embed_dim, n_channels, patch_size, patch_size), jnp.float32)
    conv_b = 0.02 * jax.random.normal(kb, (embed_dim,), jnp.float32)
    cls_token = 0.02 * jax.random.normal(kc, (1, 1, embed_dim), jnp.float32)
    pos_embedding = 0.02 * jax.random.normal(kp, (1, n_patches + 1, embed_dim), jnp.float32)

    fwd = jax.jit(functools.partial(embed_layer_forward, patch_size=patch_size))
    out = fwd(x, conv_w, conv_b, cls_token, pos_embedding)
    out = jax.block_until_ready(out)

    # Pure-JAX f32 reference (same math as the PyTorch module).
    patches_ref = jnp.transpose(
        x.reshape(batch, n_channels, img_size // patch_size, patch_size,
                  img_size // patch_size, patch_size),
        (0, 2, 4, 1, 3, 5)).reshape(batch, n_patches, patch_dim)
    conv_out = jnp.einsum("bnk,ek->bne", patches_ref,
                          conv_w.reshape(embed_dim, patch_dim)) + conv_b
    ref = jnp.concatenate(
        [jnp.broadcast_to(cls_token, (batch, 1, embed_dim)), conv_out], axis=1) + pos_embedding

    assert out.shape == (batch, n_patches + 1, embed_dim), out.shape
    # cls row involves no bf16 math -> tight check.
    assert jnp.allclose(out[:, 0, :], ref[:, 0, :], atol=1e-6, rtol=1e-6)
    # patch rows use bf16 MXU operands with f32 accumulation -> bf16-level tolerance.
    assert jnp.allclose(out, ref, atol=1e-2, rtol=1e-2)

    print("KERNEL_OK")
</pallas_src>

<mosaic_0001>
module attributes {stable_mosaic.version = 11 : i64} {
  func.func @_embed_kernel(%arg0: i32, %arg1: memref<1x17x128xbf16, #tpu.memory_space<vmem>>, %arg2: memref<128x128xbf16, #tpu.memory_space<vmem>>, %arg3: memref<17x128xf32, #tpu.memory_space<vmem>>, %arg4: memref<1x17x128xf32, #tpu.memory_space<vmem>>) attributes {dimension_semantics = [#tpu.dimension_semantics<parallel>], iteration_bounds = array<i64: 2>, scalar_prefetch = 0 : i64, scratch_operands = 0 : i64, tpu.core_type = #tpu.core_type<tc>, window_params = [{transform_indices = @transform_0, window_bounds = array<i64: 1, 17, 128>}, {pipeline_mode = #tpu.pipeline_mode<synchronous>, transform_indices = @transform_1, window_bounds = array<i64: 128, 128>}, {pipeline_mode = #tpu.pipeline_mode<synchronous>, transform_indices = @transform_2, window_bounds = array<i64: 17, 128>}, {transform_indices = @transform_3, window_bounds = array<i64: 1, 17, 128>}]} {
    %c0 = arith.constant 0 : index
    %c0_0 = arith.constant 0 : index
    %0 = vector.load %arg2[%c0, %c0_0] : memref<128x128xbf16, #tpu.memory_space<vmem>>, vector<128x128xbf16>
    %c0_1 = arith.constant 0 : index
    %c0_2 = arith.constant 0 : index
    %1 = vector.load %arg3[%c0_1, %c0_2] : memref<17x128xf32, #tpu.memory_space<vmem>>, vector<17x128xf32>
    %c0_3 = arith.constant 0 : index
    %c0_4 = arith.constant 0 : index
    %c0_5 = arith.constant 0 : index
    %2 = vector.load %arg1[%c0_3, %c0_4, %c0_5] : memref<1x17x128xbf16, #tpu.memory_space<vmem>>, vector<1x17x128xbf16>
    %3 = vector.shape_cast %2 : vector<1x17x128xbf16> to vector<17x128xbf16>
    %cst = arith.constant dense<0.000000e+00> : vector<17x128xf32>
    %4 = tpu.matmul %3, %0, %cst {dimension_numbers = #tpu.dot_dimension_numbers<[1], [0], [0], [1], [0, 0, 1, 1], [], []>} : vector<17x128xbf16>, vector<128x128xbf16>, vector<17x128xf32> -> vector<17x128xf32>
    %5 = arith.addf %4, %1 : vector<17x128xf32>
    %c0_6 = arith.constant 0 : index
    %c0_7 = arith.constant 0 : index
    %c0_8 = arith.constant 0 : index
    %6 = vector.load %arg4[%c0_6, %c0_7, %c0_8] : memref<1x17x128xf32, #tpu.memory_space<vmem>>, vector<1x17x128xf32>
    %7 = vector.shape_cast %6 : vector<1x17x128xf32> to vector<17x128xf32>
    %8 = vector.shape_cast %5 : vector<17x128xf32> to vector<1x17x128xf32>
    tpu.vector_store %arg4[%c0_6, %c0_7, %c0_8], %8 {strides = array<i32>} : memref<1x17x128xf32, #tpu.memory_space<vmem>>, vector<1x17x128xf32>,
    return
  }
  func.func @transform_0(%arg0: i32) -> (i32, i32, i32) {
    %c0_i32 = arith.constant 0 : i32
    %c0_i32_0 = arith.constant 0 : i32
    %c0_i32_1 = arith.constant 0 : i32
    return %arg0, %c0_i32, %c0_i32_0 : i32, i32, i32
  }
  func.func @transform_1(%arg0: i32) -> (i32, i32) {
    %c0_i32 = arith.constant 0 : i32
    %c0_i32_0 = arith.constant 0 : i32
    %c0_i32_1 = arith.constant 0 : i32
    return %c0_i32, %c0_i32_0 : i32, i32
  }
  func.func @transform_2(%arg0: i32) -> (i32, i32) {
    %c0_i32 = arith.constant 0 : i32
    %c0_i32_0 = arith.constant 0 : i32
    %c0_i32_1 = arith.constant 0 : i32
    return %c0_i32, %c0_i32_0 : i32, i32
  }
  func.func @transform_3(%arg0: i32) -> (i32, i32, i32) {
    %c0_i32 = arith.constant 0 : i32
    %c0_i32_0 = arith.constant 0 : i32
    %c0_i32_1 = arith.constant 0 : i32
    return %arg0, %c0_i32, %c0_i32_0 : i32, i32, i32
  }
}

</mosaic_0001>

<bundles_post_ra>
// kernel: embed_layer_forward.1
= control target key start
LH: loop header
LB: loop body
LE: loop exit
PB: predicated region body
PF: predicated region fallthrough
CT: control target
= control target key end

     0   :  { %s455_s12 = smov 0   ;;  %s509_s0 = inlined_call_operand.vmem [shape: bf16[2,17,128], index: 0, kind: input, shape index: {}]   ;;  %s510_s1 = inlined_call_operand.vmem [shape: bf16[128,128], index: 1, kind: input, shape index: {}]   ;;  %s511_s2 = inlined_call_operand.vmem [shape: f32[17,128], index: 2, kind: input, shape index: {}]   ;;  %s512_s3 = inlined_call_operand.vmem [shape: f32[2,17,128], index: 3, kind: output, shape index: {}]  }
   0x1 LB: > { %s358_s13 = sadd.s32 4294967295, %s433_s12   ;;  %p362_p0 = scmp.ge.s32.totalorder %s433_s12, 1  ;;  %s433_s12 = sphi %s455_s12, %s13_s12  }
   0x2   : > { %p137_p1 = scmp.lt.s32.totalorder %s433_s12, 3 }
   0x4   : > { %p138_p2 = pnand %p362_p0, %p137_p1 }
   0x5   : > { %p161_p3 = scmp.lt.s32.totalorder (!%p138_p2), %s358_s13, 1 }
   0x6   : > { %141 = sbr.rel (%p138_p2) target bundleno = 246 (0xf6), region = 32 }
   0xb   : > { %v417_v0 = vld [vmem:[%s510_s1 + $0x38] sm:$0xff]   ;;  %v418_v1 = vld [vmem:[%s510_s1 + $0x30] sm:$0xff]   ;;  %s514_s13 = smov (!%p161_p3, %s358_s13), 1  ;;  %v419_v2 = vld [vmem:[%s510_s1 + $0x28] sm:$0xff]  }
   0xc   : > { %387 = vmatprep.subr.bf16.mxu0 %v417_v0  ;;  %s407_s20 = smul.u32 12, %s514_s13  ;;  %v420_v3 = vld [vmem:[%s510_s1 + $0x20] sm:$0xff]   ;;  %v421_v5 = vld [vmem:[%s510_s1 + $0x18] sm:$0xff]   ;;  %v422_v6 = vld [vmem:[%s510_s1 + $0x10] sm:$0xff]  }
   0xd   : > { %388 = vmatpush3.bf16.msra.mxu0 %v417_v0  ;;  %v423_v7 = vld [vmem:[%s510_s1 + $0x8] sm:$0xff]   ;;  %v424_v8 = vld [vmem:[%s510_s1] sm:$0xff]   ;;  %s408_s7 = smul.u32 24, %s514_s13  ;;  %v190_v10 = vld [vmem:[%s511_s2 + $0x10] sm:$0x1] }
   0xe   : > { %389 = vmatprep.subr.bf16.mxu0 %v418_v1  ;;  %s165_s23 = scalar_lea.vmem %s509_s0, %s407_s20  ;;  %v188_v12 = vld [vmem:[%s511_s2] sm:$0xff]  ;;  %v189_v17 = vld [vmem:[%s511_s2 + $0x8] sm:$0xff] }
   0xf   : > { %v425_v4 = vld [vmem:[%s165_s23] sm:$0xff]   ;;  %v426_v9 = vld [vmem:[%s165_s23 + $0x8] ss:$0 sps:$4 sm:$0x11]   ;;  %s170_s14 = scalar_lea.vmem %s512_s3, %s408_s7 }
  0x10   : > { %403 = vmatprep.mubr.bf16.mxu0 %v425_v4 }
  0x11   : > { %390 = vmatpush3.bf16.msra.mxu0 %v418_v1 }
  0x12   : > { %391 = vmatprep.subr.bf16.mxu0 %v419_v2 }
  0x15   : > { %392 = vmatpush3.bf16.msra.mxu0 %v419_v2 }
  0x16   : > { %393 = vmatprep.subr.bf16.mxu0 %v420_v3 }
  0x19   : > { %394 = vmatpush3.bf16.msra.mxu0 %v420_v3 }
  0x1a   : > { %395 = vmatprep.subr.bf16.mxu0 %v421_v5 }
  0x1d   : > { %396 = vmatpush3.bf16.msra.mxu0 %v421_v5 }
  0x1e   : > { %397 = vmatprep.subr.bf16.mxu0 %v422_v6 }
  0x21   : > { %398 = vmatpush3.bf16.msra.mxu0 %v422_v6 }
  0x22   : > { %399 = vmatprep.subr.bf16.mxu0 %v423_v7 }
  0x25   : > { %400 = vmatpush3.bf16.msra.mxu0 %v423_v7 }
  0x26   : > { %401 = vmatprep.subr.bf16.mxu0 %v424_v8 }
  0x29   : > { %402 = vmatpush3.bf16.msra.mxu0 %v424_v8 }
  0x2c   : > { %404 = vmatmul.mubr.bf16.vlgmr.msra.gmra.mxu0 %v426_v9 }
  0xec   : > { %v405_v11 = vpop.f32.mrf.mxu0 }
  0xed   : > { %v295_v13 = vadd.f32 %v405_v11, %v190_v10 }
  0xee   : > { %v286_v14 = vpop.f32.mrf.mxu0 }
  0xef   : > { %302 = vst [vmem:[%s170_s14 + $0x10] sm:$0x1] %v295_v13  ;;  %v287_v15 = vadd.f32 %v286_v14, %v188_v12 }
  0xf0   : > { %v406_v16 = vpop.f32.mrf.mxu0 }
  0xf1   : > { %300 = vst [vmem:[%s170_s14] sm:$0xff] %v287_v15 }
  0xf2   : > { %v289_v18 = vpop.f32.mrf.mxu0 }
  0xf3   : > { %v290_v19 = vadd.f32 %v289_v18, %v189_v17 }
  0xf5   : > { %301 = vst [vmem:[%s170_s14 + $0x8] sm:$0xff] %v290_v19 }
  0xf6 PF: > { %s13_s12 = sadd.s32 1, %s433_s12  }
  0xf7   : > { %p10_p4 = scmp.ge.s32.totalorder %s13_s12, 4  }
  0xf9   :  { %12 = sbr.rel (!%p10_p4) target bundleno = 1 (0x1), region = 62 }

</bundles_post_ra>
